<compile_context>
chip_gen: v7x
topology: tpu7x:2x2x1
jax: 0.10.0
libtpu: 0.0.40
codegen_flags: <defaults>
</compile_context>

<pallas_src>
import functools

import jax
import jax.numpy as jnp
from jax import lax
from jax.experimental import pallas as pl
from jax.experimental.pallas import tpu as pltpu


def encoder_kernel(xT_ref, w1_ref, b1_ref, w2_ref, b2_ref, w3_ref, b3_ref,
                   outT_ref, *, chunk):
    """One grid step: y^T block for one lane-block of the batch.

    Batch lives on the LANE axis, so every intermediate and the output store are
    lane-dense / unmasked.  The block is processed in `chunk`-lane sub-slices so
    all intermediates stay vreg-resident even for multi-thousand-lane blocks.
    """
    w1 = w1_ref[...]
    w2 = w2_ref[...]
    w3 = w3_ref[...]
    b1 = b1_ref[...]
    b2 = b2_ref[...]
    b3 = b3_ref[...]

    block_b = xT_ref.shape[-1]
    nchunks = block_b // chunk

    def body(c, carry):
        start = pl.multiple_of(c * chunk, chunk)
        x = xT_ref[:, pl.ds(start, chunk)]                          # (D_in, C) bf16
        # fc1 + ReLU  (K=4 underfills the MXU; this kernel is overhead/IO bound)
        h = jnp.dot(w1, x, preferred_element_type=jnp.float32)      # (H2, C) f32
        h = jnp.maximum(h + b1, 0.0).astype(jnp.bfloat16)
        # fc2 + ReLU
        h = jnp.dot(w2, h, preferred_element_type=jnp.float32)      # (H, C) f32
        h = jnp.maximum(h + b2, 0.0).astype(jnp.bfloat16)
        # fc3 (no activation) — unmasked, 256-lane-aligned store.
        h = jnp.dot(w3, h, preferred_element_type=jnp.float32)      # (E, C) f32
        outT_ref[:, pl.ds(start, chunk)] = (h + b3).astype(outT_ref.dtype)
        return carry

    lax.fori_loop(0, nchunks, body, 0, unroll=True)


def _choose_block_b(B, *, max_block=8192):
    """Lane-axis block size (multiple of 128).

    Big blocks amortize the ~0.35us per-grid-step overhead.  For B > 128 we aim
    for an even grid of >= 2 steps (keeps both v7x TensorCores busy and balanced)
    while staying minimal for the single-TC v5e/v6e chips.  Blocks > 128 are
    multiples of 256 so the in-kernel 256-lane sub-chunk loop tiles evenly.
    """
    b128 = pl.cdiv(B, 128)
    if b128 <= 1:
        return 128
    steps = 2
    while pl.cdiv(b128, steps) * 128 > max_block:
        steps += 2
    blk = pl.cdiv(b128, steps) * 128
    if blk > 128:
        blk = 256 * pl.cdiv(blk, 256)
    return blk


@functools.partial(
    jax.jit,
    static_argnames=("block_b", "chunk", "out_dtype", "transposed_output"))
def cartpole_transe_forward(obs, params, *, block_b=None, chunk=256,
                            out_dtype=jnp.bfloat16, transposed_output=False):
    """CartPoleTransE.forward (the Encoder MLP) as one Pallas kernel.

    Returns (B, E) in `out_dtype` (default bf16).  transposed_output=True returns
    the raw lane-major (E, B_pad) kernel output (no slice / transpose) for fused
    downstream consumers.
    """
    w1, b1, w2, b2, w3, b3 = params          # torch layout: W (out, in), b (out,)
    B, D_in = obs.shape
    H2 = w1.shape[0]                          # 2 * hidden_dim
    H = w2.shape[0]                           # hidden_dim
    E = w3.shape[0]                           # embedding_dim

    if block_b is None:
        block_b = _choose_block_b(B)
    chunk = min(chunk, block_b)
    assert block_b % 128 == 0 and block_b % chunk == 0, (block_b, chunk)

    grid_b = pl.cdiv(B, block_b)
    B_pad = block_b * grid_b

    # Batch on lanes: x^T is (D_in, B_pad) bf16.  Under jit the transpose, pad
    # and cast fuse into one pass over the (tiny, D_in*B) observation tensor.
    xT = obs.T
    if B_pad != B:
        xT = jnp.pad(xT, ((0, 0), (0, B_pad - B)))
    xT = xT.astype(jnp.bfloat16)

    w1b = w1.astype(jnp.bfloat16)
    w2b = w2.astype(jnp.bfloat16)
    w3b = w3.astype(jnp.bfloat16)
    b1c = b1.reshape(H2, 1).astype(jnp.float32)
    b2c = b2.reshape(H, 1).astype(jnp.float32)
    b3c = b3.reshape(E, 1).astype(jnp.float32)

    out_itemsize = jnp.dtype(out_dtype).itemsize
    flops = 2 * B_pad * (D_in * H2 + H2 * H + H * E)
    bytes_accessed = int(B_pad * D_in * 2 + B_pad * E * out_itemsize
                         + 2 * (D_in * H2 + H2 * H + H * E)
                         + 4 * (H2 + H + E))

    kernel = functools.partial(encoder_kernel, chunk=chunk)

    outT = pl.pallas_call(
        kernel,
        out_shape=jax.ShapeDtypeStruct((E, B_pad), out_dtype),
        grid_spec=pl.GridSpec(
            grid=(grid_b,),
            in_specs=[
                pl.BlockSpec((D_in, block_b), lambda i: (0, i)),   # x^T tile (batch on lanes)
                pl.BlockSpec((H2, D_in), lambda i: (0, 0)),        # w1 (VMEM-resident)
                pl.BlockSpec((H2, 1), lambda i: (0, 0)),           # b1
                pl.BlockSpec((H, H2), lambda i: (0, 0)),           # w2
                pl.BlockSpec((H, 1), lambda i: (0, 0)),            # b2
                pl.BlockSpec((E, H), lambda i: (0, 0)),            # w3
                pl.BlockSpec((E, 1), lambda i: (0, 0)),            # b3
            ],
            out_specs=pl.BlockSpec((E, block_b), lambda i: (0, i)),
        ),
        compiler_params=pltpu.CompilerParams(
            dimension_semantics=("parallel",),           # megacore sharding over batch tiles
            vmem_limit_bytes=16 * 1024 * 1024,           # ~1.5 MiB actually used; safe on v5e/v6e/v7x
        ),
        cost_estimate=pl.CostEstimate(
            flops=flops, transcendentals=0, bytes_accessed=bytes_accessed),
    )(xT, w1b, b1c, w2b, b2c, w3b, b3c)

    if transposed_output:
        return outT                       # (E, B_pad), lane-major, padded batch
    return outT[:, :B].T                  # module layout (B, E)


def init_encoder_params(key, input_dim, hidden_dim, embedding_dim):
    """Deterministic init mimicking torch.nn.Linear default (U[-1/sqrt(fan_in), ...]).
    Weights stored in torch layout (out_dim, in_dim)."""
    def linear(key, fan_in, fan_out):
        kw, kb = jax.random.split(key)
        bound = 1.0 / jnp.sqrt(jnp.float32(fan_in))
        w = jax.random.uniform(kw, (fan_out, fan_in), jnp.float32, -bound, bound)
        b = jax.random.uniform(kb, (fan_out,), jnp.float32, -bound, bound)
        return w, b

    k1, k2, k3 = jax.random.split(key, 3)
    w1, b1 = linear(k1, input_dim, 2 * hidden_dim)        # fc1
    w2, b2 = linear(k2, 2 * hidden_dim, hidden_dim)       # fc2
    w3, b3 = linear(k3, hidden_dim, embedding_dim)        # fc3
    return (w1, b1, w2, b2, w3, b3)


def reference_forward_f32(obs, params):
    w1, b1, w2, b2, w3, b3 = params
    h = jnp.maximum(obs @ w1.T + b1, 0.0)
    h = jnp.maximum(h @ w2.T + b2, 0.0)
    return h @ w3.T + b3


def reference_forward_bf16(obs, params):
    """Mirrors the kernel's bf16 weight/activation casts (f32 accumulate + f32 bias)."""
    w1, b1, w2, b2, w3, b3 = params
    x = obs.astype(jnp.bfloat16)
    h = jnp.dot(x, w1.T.astype(jnp.bfloat16), preferred_element_type=jnp.float32) + b1
    h = jnp.maximum(h, 0.0).astype(jnp.bfloat16)
    h = jnp.dot(h, w2.T.astype(jnp.bfloat16), preferred_element_type=jnp.float32) + b2
    h = jnp.maximum(h, 0.0).astype(jnp.bfloat16)
    return jnp.dot(h, w3.T.astype(jnp.bfloat16), preferred_element_type=jnp.float32) + b3


if __name__ == "__main__":
    # CartPole: observation dim = 4; small hidden / embedding dims.
    batch = 8              # single rollout step; one 128-lane tile
    input_dims = 4
    hidden_dim = 32
    embedding_dim = 16

    key = jax.random.PRNGKey(0)
    k_obs, k_params, k_obs2 = jax.random.split(key, 3)

    obs = jax.random.normal(k_obs, (batch, input_dims), jnp.float32)
    params = init_encoder_params(k_params, input_dims, hidden_dim, embedding_dim)

    # Small-batch path (grid=1, single 128-lane sub-chunk).
    out = jax.block_until_ready(cartpole_transe_forward(obs, params))
    assert out.shape == (batch, embedding_dim)
    out_f32 = out.astype(jnp.float32)
    ref_bf16 = reference_forward_bf16(obs, params)
    ref_f32 = reference_forward_f32(obs, params)
    assert jnp.allclose(out_f32, ref_bf16, atol=2e-2, rtol=2e-2), "mismatch vs bf16 reference"
    assert jnp.allclose(out_f32, ref_f32, atol=6e-2, rtol=6e-2), "mismatch vs f32 reference"

    # Multi-step grid + padding + unrolled sub-chunk loop path
    # (B=1000 -> block_b=512, grid=2, B_pad=1024, 2x256-lane sub-chunks/step).
    obs_big = jax.random.normal(k_obs2, (1000, input_dims), jnp.float32)
    out_big = jax.block_until_ready(cartpole_transe_forward(obs_big, params))
    assert out_big.shape == (1000, embedding_dim)
    ref_big = reference_forward_bf16(obs_big, params)
    assert jnp.allclose(out_big.astype(jnp.float32), ref_big, atol=2e-2, rtol=2e-2), \
        "mismatch vs bf16 reference (large batch)"

    # TODO(synk): energy / transition_loss / contrastive_loss paths (TransitionMLP,
    # LayerNorm, one-hot actions, numpy permutation) are training-time utilities not
    # exercised by forward(); omitted.
    print("KERNEL_OK")
</pallas_src>

<mosaic_0001>
module attributes {stable_mosaic.version = 11 : i64} {
  func.func @encoder_kernel(%arg0: i32, %arg1: memref<4x128xbf16, #tpu.memory_space<vmem>>, %arg2: memref<64x4xbf16, #tpu.memory_space<vmem>>, %arg3: memref<64x1xf32, #tpu.memory_space<vmem>>, %arg4: memref<32x64xbf16, #tpu.memory_space<vmem>>, %arg5: memref<32x1xf32, #tpu.memory_space<vmem>>, %arg6: memref<16x32xbf16, #tpu.memory_space<vmem>>, %arg7: memref<16x1xf32, #tpu.memory_space<vmem>>, %arg8: memref<16x128xbf16, #tpu.memory_space<vmem>>) attributes {dimension_semantics = [#tpu.dimension_semantics<parallel>], iteration_bounds = array<i64: 1>, scalar_prefetch = 0 : i64, scratch_operands = 0 : i64, tpu.core_type = #tpu.core_type<tc>, window_params = [{transform_indices = @transform_0, window_bounds = array<i64: 4, 128>}, {pipeline_mode = #tpu.pipeline_mode<synchronous>, transform_indices = @transform_1, window_bounds = array<i64: 64, 4>}, {pipeline_mode = #tpu.pipeline_mode<synchronous>, transform_indices = @transform_2, window_bounds = array<i64: 64, 1>}, {pipeline_mode = #tpu.pipeline_mode<synchronous>, transform_indices = @transform_3, window_bounds = array<i64: 32, 64>}, {pipeline_mode = #tpu.pipeline_mode<synchronous>, transform_indices = @transform_4, window_bounds = array<i64: 32, 1>}, {pipeline_mode = #tpu.pipeline_mode<synchronous>, transform_indices = @transform_5, window_bounds = array<i64: 16, 32>}, {pipeline_mode = #tpu.pipeline_mode<synchronous>, transform_indices = @transform_6, window_bounds = array<i64: 16, 1>}, {transform_indices = @transform_7, window_bounds = array<i64: 16, 128>}]} {
    %c0 = arith.constant 0 : index
    %c0_0 = arith.constant 0 : index
    %0 = vector.load %arg2[%c0, %c0_0] : memref<64x4xbf16, #tpu.memory_space<vmem>>, vector<64x4xbf16>
    %c0_1 = arith.constant 0 : index
    %c0_2 = arith.constant 0 : index
    %1 = vector.load %arg4[%c0_1, %c0_2] : memref<32x64xbf16, #tpu.memory_space<vmem>>, vector<32x64xbf16>
    %c0_3 = arith.constant 0 : index
    %c0_4 = arith.constant 0 : index
    %2 = vector.load %arg6[%c0_3, %c0_4] : memref<16x32xbf16, #tpu.memory_space<vmem>>, vector<16x32xbf16>
    %c0_5 = arith.constant 0 : index
    %c0_6 = arith.constant 0 : index
    %3 = vector.load %arg3[%c0_5, %c0_6] : memref<64x1xf32, #tpu.memory_space<vmem>>, vector<64x1xf32>
    %c0_7 = arith.constant 0 : index
    %c0_8 = arith.constant 0 : index
    %4 = vector.load %arg5[%c0_7, %c0_8] : memref<32x1xf32, #tpu.memory_space<vmem>>, vector<32x1xf32>
    %c0_9 = arith.constant 0 : index
    %c0_10 = arith.constant 0 : index
    %5 = vector.load %arg7[%c0_9, %c0_10] : memref<16x1xf32, #tpu.memory_space<vmem>>, vector<16x1xf32>
    %c0_i32 = arith.constant 0 : i32
    %c128_i32 = arith.constant 128 : i32
    %6 = arith.muli %c0_i32, %c128_i32 : i32
    %7 = tpu.assume_multiple %6, 128 : i32
    %c0_11 = arith.constant 0 : index
    %8 = arith.index_cast %7 : i32 to index
    %9 = vector.load %arg1[%c0_11, %8] : memref<4x128xbf16, #tpu.memory_space<vmem>>, vector<4x128xbf16>
    %cst = arith.constant dense<0.000000e+00> : vector<64x128xf32>
    %10 = tpu.matmul %0, %9, %cst {dimension_numbers = #tpu.dot_dimension_numbers<[1], [0], [0], [1], [0, 0, 1, 1], [], []>} : vector<64x4xbf16>, vector<4x128xbf16>, vector<64x128xf32> -> vector<64x128xf32>
    %11 = vector.broadcast %3 : vector<64x1xf32> to vector<64x128xf32>
    %12 = arith.addf %10, %11 : vector<64x128xf32>
    %cst_12 = arith.constant 0.000000e+00 : f32
    %13 = vector.broadcast %cst_12 : f32 to vector<64x128xf32>
    %14 = arith.maximumf %12, %13 : vector<64x128xf32>
    %15 = arith.truncf %14 : vector<64x128xf32> to vector<64x128xbf16>
    %cst_13 = arith.constant dense<0.000000e+00> : vector<32x128xf32>
    %16 = tpu.matmul %1, %15, %cst_13 {dimension_numbers = #tpu.dot_dimension_numbers<[1], [0], [0], [1], [0, 0, 1, 1], [], []>} : vector<32x64xbf16>, vector<64x128xbf16>, vector<32x128xf32> -> vector<32x128xf32>
    %17 = vector.broadcast %4 : vector<32x1xf32> to vector<32x128xf32>
    %18 = arith.addf %16, %17 : vector<32x128xf32>
    %cst_14 = arith.constant 0.000000e+00 : f32
    %19 = vector.broadcast %cst_14 : f32 to vector<32x128xf32>
    %20 = arith.maximumf %18, %19 : vector<32x128xf32>
    %21 = arith.truncf %20 : vector<32x128xf32> to vector<32x128xbf16>
    %cst_15 = arith.constant dense<0.000000e+00> : vector<16x128xf32>
    %22 = tpu.matmul %2, %21, %cst_15 {dimension_numbers = #tpu.dot_dimension_numbers<[1], [0], [0], [1], [0, 0, 1, 1], [], []>} : vector<16x32xbf16>, vector<32x128xbf16>, vector<16x128xf32> -> vector<16x128xf32>
    %23 = vector.broadcast %5 : vector<16x1xf32> to vector<16x128xf32>
    %24 = arith.addf %22, %23 : vector<16x128xf32>
    %25 = arith.truncf %24 : vector<16x128xf32> to vector<16x128xbf16>
    %c0_16 = arith.constant 0 : index
    %26 = arith.index_cast %7 : i32 to index
    %27 = vector.load %arg8[%c0_16, %26] : memref<16x128xbf16, #tpu.memory_space<vmem>>, vector<16x128xbf16>
    tpu.vector_store %arg8[%c0_16, %26], %25 {strides = array<i32>} : memref<16x128xbf16, #tpu.memory_space<vmem>>, vector<16x128xbf16>,
    %c1_i32 = arith.constant 1 : i32
    return
  }
  func.func @transform_0(%arg0: i32) -> (i32, i32) {
    %c0_i32 = arith.constant 0 : i32
    %c0_i32_0 = arith.constant 0 : i32
    return %c0_i32, %arg0 : i32, i32
  }
  func.func @transform_1(%arg0: i32) -> (i32, i32) {
    %c0_i32 = arith.constant 0 : i32
    %c0_i32_0 = arith.constant 0 : i32
    %c0_i32_1 = arith.constant 0 : i32
    return %c0_i32, %c0_i32_0 : i32, i32
  }
  func.func @transform_2(%arg0: i32) -> (i32, i32) {
    %c0_i32 = arith.constant 0 : i32
    %c0_i32_0 = arith.constant 0 : i32
    %c0_i32_1 = arith.constant 0 : i32
    return %c0_i32, %c0_i32_0 : i32, i32
  }
  func.func @transform_3(%arg0: i32) -> (i32, i32) {
    %c0_i32 = arith.constant 0 : i32
    %c0_i32_0 = arith.constant 0 : i32
    %c0_i32_1 = arith.constant 0 : i32
    return %c0_i32, %c0_i32_0 : i32, i32
  }
  func.func @transform_4(%arg0: i32) -> (i32, i32) {
    %c0_i32 = arith.constant 0 : i32
    %c0_i32_0 = arith.constant 0 : i32
    %c0_i32_1 = arith.constant 0 : i32
    return %c0_i32, %c0_i32_0 : i32, i32
  }
  func.func @transform_5(%arg0: i32) -> (i32, i32) {
    %c0_i32 = arith.constant 0 : i32
    %c0_i32_0 = arith.constant 0 : i32
    %c0_i32_1 = arith.constant 0 : i32
    return %c0_i32, %c0_i32_0 : i32, i32
  }
  func.func @transform_6(%arg0: i32) -> (i32, i32) {
    %c0_i32 = arith.constant 0 : i32
    %c0_i32_0 = arith.constant 0 : i32
    %c0_i32_1 = arith.constant 0 : i32
    return %c0_i32, %c0_i32_0 : i32, i32
  }
  func.func @transform_7(%arg0: i32) -> (i32, i32) {
    %c0_i32 = arith.constant 0 : i32
    %c0_i32_0 = arith.constant 0 : i32
    return %c0_i32, %arg0 : i32, i32
  }
}

</mosaic_0001>

<bundles_post_ra>
// kernel: cartpole_transe_forward.1
= control target key start
LH: loop header
LB: loop body
LE: loop exit
PB: predicated region body
PF: predicated region fallthrough
CT: control target
= control target key end

     0   :  { %vm129_vm0 = vcmask 1041408   ;;  %vm116_vm1 = vcmask 31744   ;;  %v456_v1 = vmov 0   ;;  %vm240_vm2 = vcmask 523264   ;;  %s574_s0 = inlined_call_operand.vmem [shape: bf16[4,128], index: 0, kind: input, shape index: {}]   ;;  %s575_s1 = inlined_call_operand.vmem [shape: bf16[64,4], index: 1, kind: input, shape index: {}]   ;;  %s576_s2 = inlined_call_operand.vmem [shape: f32[64,1], index: 2, kind: input, shape index: {}]   ;;  %s577_s4 = inlined_call_operand.vmem [shape: f32[32,1], index: 4, kind: input, shape index: {}]   ;;  %s578_s6 = inlined_call_operand.vmem [shape: f32[16,1], index: 6, kind: input, shape index: {}]   ;;  %s579_s3 = inlined_call_operand.vmem [shape: bf16[32,64], index: 3, kind: input, shape index: {}]   ;;  %s580_s5 = inlined_call_operand.vmem [shape: bf16[16,32], index: 5, kind: input, shape index: {}]   ;;  %s581_s7 = inlined_call_operand.vmem [shape: bf16[16,128], index: 7, kind: output, shape index: {}]  }
   0x1   :  { %v55_v0 = vld [vmem:[%s574_s0] sm:$0x3]  ;;  %447 = vset.pattern.permute.xlu0 %v456_v1  ;;  %448 = vset.pattern.permute.xlu1 %v456_v1  ;;  %v450_v4 = vld [vmem:[%s575_s1 + $0x8] sm:$0xff]   ;;  %v451_v5 = vld [vmem:[%s575_s1 + $0x10] sm:$0xff]   ;;  %v457_v59 = vmov 0.0   ;;  %vm458_vm3 = vmmov 0  }
   0x2   :  { %443 = vmatprep.subr.msk.bf16.mxu0 %vm129_vm0, %v55_v0  ;;  %v131_v2 = vsel %vm129_vm0, %v55_v0, 0  ;;  %v449_v3 = vld [vmem:[%s575_s1] sm:$0xff]   ;;  %v43_v7 = vld [vmem:[%s576_s2 + $0x10] sm:$0xff]  ;;  %v42_v8 = vld [vmem:[%s576_s2 + $0x8] sm:$0xff]  ;;  %vm317_vm4 = vcmask 261120  }
   0x3   :  { %414 = vmatpush3.bf16.msra.mxu0 %v131_v2  ;;  %415 = vmatprep.mubr.msk.bf16.mxu0 %vm116_vm1, %v449_v3  ;;  %v41_v6 = vld [vmem:[%s576_s2] sm:$0xff]  ;;  %v44_v9 = vld [vmem:[%s576_s2 + $0x18] sm:$0xff]  ;;  %v46_v12 = vld [vmem:[%s576_s2 + $0x28] sm:$0xff] }
   0x4   :  { %58 = vperm.xlu0 %447, %v41_v6   ;;  %68 = vperm.xlu1 %448, %v43_v7   ;;  %v452_v10 = vld [vmem:[%s575_s1 + $0x18] sm:$0xff]   ;;  %v45_v11 = vld [vmem:[%s576_s2 + $0x20] sm:$0xff]  ;;  %v47_v13 = vld [vmem:[%s576_s2 + $0x30] sm:$0xff] }
   0x5   :  { %v48_v14 = vld [vmem:[%s576_s2 + $0x38] sm:$0xff]  ;;  %v49_v15 = vld [vmem:[%s577_s4] sm:$0xff]  ;;  %v50_v16 = vld [vmem:[%s577_s4 + $0x8] sm:$0xff]  ;;  %435 = vmatprep.subr.bf16.mxu0 %v457_v59 }
   0x6   :  { %416 = vmatmul.mubr.msk.bf16.vlgmr.msra.gmra.mrb[0].mxu0 %vm116_vm1, %v450_v4  ;;  %v51_v17 = vld [vmem:[%s577_s4 + $0x10] sm:$0xff]  ;;  %v52_v18 = vld [vmem:[%s577_s4 + $0x18] sm:$0xff]  ;;  %v53_v19 = vld [vmem:[%s578_s6] sm:$0xff] }
   0x7   :  { %419 = vmatprep.mubr.msk.bf16.mxu0 %vm116_vm1, %v451_v5  ;;  %v54_v20 = vld [vmem:[%s578_s6 + $0x8] sm:$0xff]  ;;  %v453_v21 = vld [vmem:[%s579_s3] sm:$0xff]  }
   0x8   :  { %63 = vperm.xlu0 %447, %v42_v8   ;;  %73 = vperm.xlu1 %448, %v44_v9   ;;  %v454_v58 = vld [vmem:[%s579_s3 + $0x8] sm:$0xff]  }
   0x9   :  { %431 = vmatprep.mubr.msk.bf16.mxu1 %vm240_vm2, %v453_v21 }
   0xc   :  { %78 = vperm.xlu0 %447, %v45_v11   ;;  %83 = vperm.xlu1 %448, %v46_v12  }
   0xe   :  { %420 = vmatmul.mubr.msk.bf16.gmra.mrb[4].mxu0 %vm116_vm1, %v452_v10 }
   0xf   :  { %439 = vmatprep.mubr.msk.bf16.mxu0 %vm458_vm3, %v457_v59 }
  0x10   :  { %88 = vperm.xlu0 %447, %v47_v13   ;;  %93 = vperm.xlu1 %448, %v48_v14   ;;  %v455_v14 = vld [vmem:[%s580_s5] sm:$0xff]  }
  0x14   :  { %212 = vperm.xlu0 %447, %v49_v15   ;;  %217 = vperm.xlu1 %448, %v50_v16  }
  0x18   :  { %222 = vperm.xlu0 %447, %v51_v17   ;;  %227 = vperm.xlu1 %448, %v52_v18  }
  0x1c   :  { %304 = vperm.xlu0 %447, %v53_v19   ;;  %309 = vperm.xlu1 %448, %v54_v20  }
  0x83   :  { %v59_v22 = vpop.permute.xlu0 %58  ;;  %v69_v23 = vpop.permute.xlu1 %68 }
  0x87   :  { %v64_v24 = vpop.permute.xlu0 %63  ;;  %v74_v25 = vpop.permute.xlu1 %73 }
  0x8b   :  { %v79_v29 = vpop.permute.xlu0 %78  ;;  %v84_v34 = vpop.permute.xlu1 %83 }
  0x8f   :  { %v89_v41 = vpop.permute.xlu0 %88  ;;  %v94_v46 = vpop.permute.xlu1 %93 }
  0x93   :  { %v213_v60 = vpop.permute.xlu0 %212  ;;  %v218_v61 = vpop.permute.xlu1 %217 }
  0x97   :  { %v223_v62 = vpop.permute.xlu0 %222  ;;  %v228_v2 = vpop.permute.xlu1 %227 }
  0x9b   :  { %v305_v16 = vpop.permute.xlu0 %304  ;;  %v310_v18 = vpop.permute.xlu1 %309 }
  0xd9   :  { %v417_v26 = vpop.f32.mrb[0].mxu0 }
  0xda   :  { %v176_v27 = vadd.f32 %v417_v26, %v69_v23  ;;  %v167_v28 = vpop.f32.mrb[1].mxu0 }
  0xdb   :  { %v168_v30 = vadd.f32 %v167_v28, %v59_v22  ;;  %v418_v31 = vpop.f32.mrb[2].mxu0 }
  0xdc   :  { %v179_v32 = vadd.f32 %v418_v31, %v74_v25  ;;  %v170_v33 = vpop.f32.mrb[3].mxu0  ;;  %v200_v36 = vmax.f32 %v176_v27, 0.0 }
  0xdd   :  { %v171_v35 = vadd.f32 %v170_v33, %v64_v24  ;;  %v198_v38 = vmax.f32 %v168_v30, 0.0 }
  0xde   :  { %v201_v37 = vmax.f32 %v179_v32, 0.0 }
  0xdf   :  { %v199_v39 = vmax.f32 %v171_v35, 0.0 }
  0xe0   :  { %v207_v40 = vpack.c.bf16 %v201_v37, %v200_v36 }
  0xe1   :  { %v421_v42 = vpop.f32.mrb[4].mxu0  ;;  %v206_v43 = vpack.c.bf16 %v199_v39, %v198_v38 }
  0xe2   :  { %v192_v44 = vadd.f32 %v421_v42, %v89_v41  ;;  %v183_v45 = vpop.f32.mrb[5].mxu0 }
  0xe3   :  { %v184_v47 = vadd.f32 %v183_v45, %v79_v29  ;;  %v422_v48 = vpop.f32.mrb[6].mxu0  ;;  %423 = vmatprep.subr.bf16.mxu1 %v206_v43 }
  0xe4   :  { %v195_v49 = vadd.f32 %v422_v48, %v94_v46  ;;  %v186_v50 = vpop.f32.mrb[7].mxu0  ;;  %424 = vmatpush3.bf16.msra.mxu1 %v206_v43  ;;  %v204_v52 = vmax.f32 %v192_v44, 0.0 }
  0xe5   :  { %v187_v51 = vadd.f32 %v186_v50, %v84_v34  ;;  %425 = vmatprep.subr.bf16.mxu1 %v207_v40  ;;  %v202_v54 = vmax.f32 %v184_v47, 0.0 }
  0xe6   :  { %v205_v53 = vmax.f32 %v195_v49, 0.0 }
  0xe7   :  { %v203_v55 = vmax.f32 %v187_v51, 0.0 }
  0xe8   :  { %v209_v56 = vpack.c.bf16 %v205_v53, %v204_v52  ;;  %426 = vmatpush3.bf16.msra.mxu1 %v207_v40 }
  0xe9   :  { %v208_v57 = vpack.c.bf16 %v203_v55, %v202_v54 }
  0xeb   :  { %427 = vmatprep.subr.bf16.mxu1 %v208_v57 }
  0xec   :  { %428 = vmatpush3.bf16.msra.mxu1 %v208_v57 }
  0xed   :  { %429 = vmatprep.subr.bf16.mxu1 %v209_v56 }
  0xf0   :  { %430 = vmatpush3.bf16.msra.mxu1 %v209_v56 }
  0xf3   :  { %432 = vmatmul.mubr.msk.bf16.vlgmr.msra.gmra.mrb[0].mxu1 %vm240_vm2, %v454_v58 }
 0x1c6   :  { %v433_v63 = vpop.f32.mrb[0].mxu1 }
 0x1c7   :  { %v290_v0 = vadd.f32 %v433_v63, %v223_v62  ;;  %v281_v1 = vpop.f32.mrb[1].mxu1 }
 0x1c8   :  { %v282_v3 = vadd.f32 %v281_v1, %v213_v60  ;;  %v434_v4 = vpop.f32.mrb[2].mxu1 }
 0x1c9   :  { %v293_v5 = vadd.f32 %v434_v4, %v228_v2  ;;  %v284_v6 = vpop.f32.mrb[3].mxu1  ;;  %v298_v8 = vmax.f32 %v290_v0, 0.0 }
 0x1ca   :  { %v285_v7 = vadd.f32 %v284_v6, %v218_v61  ;;  %v296_v10 = vmax.f32 %v282_v3, 0.0 }
 0x1cb   :  { %v299_v9 = vmax.f32 %v293_v5, 0.0 }
 0x1cc   :  { %v297_v11 = vmax.f32 %v285_v7, 0.0 }
 0x1cd   :  { %v301_v12 = vpack.c.bf16 %v299_v9, %v298_v8 }
 0x1ce   :  { %v300_v13 = vpack.c.bf16 %v297_v11, %v296_v10 }
 0x1d0   :  { %436 = vmatpush3.bf16.msra.mxu0 %v300_v13 }
 0x1d1   :  { %437 = vmatprep.subr.bf16.mxu0 %v457_v59 }
 0x1d4   :  { %438 = vmatpush3.bf16.msra.mxu0 %v301_v12 }
 0x1d7   :  { %440 = vmatmul.mubr.msk.bf16.vlgmr.msra.gmra.mrb[8].mxu0 %vm317_vm4, %v455_v14 }
 0x2aa   :  { %v355_v15 = vpop.f32.mrb[8].mxu0 }
 0x2ab   :  { %v441_v17 = vpop.f32.mrb[9].mxu0  ;;  %v356_v20 = vadd.f32 %v355_v15, %v305_v16 }
 0x2ac   :  { %v358_v19 = vpop.f32.mrb[10].mxu0 }
 0x2ad   :  { %v359_v21 = vadd.f32 %v358_v19, %v310_v18  ;;  %v442_v22 = vpop.f32.mrb[11].mxu0 }
 0x2af   :  { %v397_v23 = vpack.c.bf16 %v359_v21, %v356_v20 }
 0x2b1   :  { %398 = vst [vmem:[%s581_s7] sm:$0xff] %v397_v23  }

</bundles_post_ra>
